<compile_context>
chip_gen: v7x
topology: tpu7x:2x2x1
jax: 0.10.0
libtpu: 0.0.40
codegen_flags: <defaults>
</compile_context>

<pallas_src>
import functools

import jax
import jax.numpy as jnp
from jax.experimental import pallas as pl
from jax.experimental.pallas import tpu as pltpu


_SPLIT_THRESHOLD = 2048   # lanes: split a single medium tile in two for v7x's 2 TCs


def _round_up(x, n):
    return -(-x // n) * n


def _plan(m_lanes, max_tile_m):
    """Tile plan for the particle (lane) axis.

    Returns (tile_m, n_tiles) with tile_m a multiple of 128 and n_tiles even
    whenever > 1 (balanced across v7x's two TensorCores via the "parallel"
    grid axis).  Total padding is < n_tiles*128 + 127 lanes.  Applying _plan to
    its own padded total reproduces the same plan, so pack_state() and
    shvv_step() stay consistent.
    """
    assert max_tile_m % 128 == 0 and max_tile_m >= 128
    m128 = max(128, _round_up(m_lanes, 128))
    if m128 <= max_tile_m:
        if m128 >= _SPLIT_THRESHOLD:               # give both v7x TCs a tile
            return _round_up(-(-m128 // 2), 128), 2
        return m128, 1
    n_tiles = -(-m128 // max_tile_m)
    if n_tiles % 2:
        n_tiles += 1                               # even tile count
    tile = _round_up(-(-m128 // n_tiles), 128)
    return tile, n_tiles


# --------------------------------------------------------------------------- #
# Layout conversion (one-time, outside the integrator loop)
# --------------------------------------------------------------------------- #

def pack_state(q, p, m, *, max_tile_m=8192):
    """[B,N,D] q/p and [B,N,1] m -> packed lane-dense state [2D+1, M_pad] f32.

    Row layout: rows 0..D-1 = q, row D = m, rows D+1..2D = p.  Particles live on
    the 128-lane axis; padded lanes get m = 1 so 1/m stays finite.
    """
    B, N, D = q.shape
    M = B * N
    tile_m, n_tiles = _plan(M, max_tile_m)
    pad = tile_m * n_tiles - M
    qT = jnp.asarray(q, jnp.float32).reshape(M, D).T
    pT = jnp.asarray(p, jnp.float32).reshape(M, D).T
    mT = jnp.asarray(m, jnp.float32).reshape(M, 1).T
    qT = jnp.pad(qT, ((0, 0), (0, pad)))
    pT = jnp.pad(pT, ((0, 0), (0, pad)))
    mT = jnp.pad(mT, ((0, 0), (0, pad)), constant_values=1.0)
    return jnp.concatenate([qT, mT, pT], axis=0)


def unpack_state(state, B, N, D):
    """Packed state [2D+1, M_pad] -> (q, p) in the original [B,N,D] layout."""
    M = B * N
    q = state[0:D, :M].T.reshape(B, N, D)
    p = state[D + 1:2 * D + 1, :M].T.reshape(B, N, D)
    return q, p


def _prep_params(params, dt):
    """Pack the 10 MLP tensors into 4 lane-dense tensors.

    Mass column is folded into layer-1 (so it rides the MXU), dt**3 is folded
    into layer-2 weights and biases (tiny wrapper-side tensors).
    """
    (w1pq, w1pm, b1p, w2p, b2p, w1qp, w1qm, b1q, w2q, b2q) = [
        jnp.asarray(x, jnp.float32) for x in params]
    dt3 = jnp.asarray(dt, jnp.float32) ** 3
    # p-net layer 1 sees x_p = [q; m]    -> columns [W1pq^T | w1pm^T | b1p^T]
    w1p = jnp.concatenate([w1pq.T, w1pm.T, b1p.T], axis=1)       # [H, D+2]
    w2pb = jnp.concatenate([dt3 * w2p.T, dt3 * b2p.T], axis=1)   # [D, H+1]
    # q-net layer 1 sees x_q = [m; p]    -> columns [w1qm^T | W1qp^T | b1q^T]
    w1q = jnp.concatenate([w1qm.T, w1qp.T, b1q.T], axis=1)       # [H, D+2]
    w2qb = jnp.concatenate([dt3 * w2q.T, dt3 * b2q.T], axis=1)   # [D, H+1]
    return w1p, w2pb, w1q, w2qb


# --------------------------------------------------------------------------- #
# Kernel
# --------------------------------------------------------------------------- #

def _shvv_kernel(scal_ref,                       # SMEM: [0.5*dt*k, dt]
                 s_ref,                          # VMEM [2D+1, TM]: rows q | m | p
                 w1p_ref, w2p_ref,               # p-net:  [H, D+2], [D, H+1]
                 w1q_ref, w2q_ref,               # q-net:  [H, D+2], [D, H+1]
                 o_ref,                          # VMEM [2D+1, TM]
                 *, compute_dtype):
    D = (s_ref.shape[0] - 1) // 2
    H = w1p_ref.shape[0]

    c = scal_ref[0]          # 0.5 * dt * k (pre-folded scalar)
    dt = scal_ref[1]
    # TODO(synk): `t` is accepted by the wrapper for API parity; the synthetic
    # experiment / hypersolver are time-independent, matching the reference.

    q = s_ref[0:D, :]                     # [D, TM]  (particles on lanes)
    m = s_ref[D:D + 1, :]                 # [1, TM]
    p = s_ref[D + 1:2 * D + 1, :]         # [D, TM]

    inv_m_dt = dt / m                     # single-row exact VPU divide (EUP is hot)

    # ---- base(): symplectic velocity-Verlet --------------------------------
    p = p - c * q                         # half kick:   p += 0.5 * (-k q) * dt
    q = q + p * inv_m_dt                  # drift:       q += (p / m) * dt
    p = p - c * q                         # half kick

    # ---- hypersolver(): symplectic MLP corrections (dt^3 folded in layer 2) -
    # Stage [q; m] as rows 0..D of the output block -> contiguous layer-1
    # activation slab; the mass term then rides the (idle) MXU contraction.
    o_ref[0:D, :] = q
    o_ref[D:D + 1, :] = m
    x_p = o_ref[0:D + 1, :]                                   # [D+1, TM]

    w1p = w1p_ref[:, 0:D + 1]                                 # [H, D+1]
    b1p = w1p_ref[:, D + 1:D + 2]                             # [H, 1]
    h_p = jnp.tanh((jnp.dot(w1p, x_p, preferred_element_type=jnp.float32)
                    + b1p).astype(compute_dtype))             # bf16 tanh on v6e/v7x
    w2p = w2p_ref[:, 0:H].astype(compute_dtype)               # [D, H] (dt^3 folded)
    b2p = w2p_ref[:, H:H + 1]                                 # [D, 1] f32
    p = p + jnp.dot(w2p, h_p, preferred_element_type=jnp.float32) + b2p

    # q-net uses the corrected p (symplectic structure): stage [m; p] rows D..2D.
    o_ref[D + 1:2 * D + 1, :] = p
    x_q = o_ref[D:2 * D + 1, :]                               # [D+1, TM]

    w1q = w1q_ref[:, 0:D + 1]
    b1q = w1q_ref[:, D + 1:D + 2]
    h_q = jnp.tanh((jnp.dot(w1q, x_q, preferred_element_type=jnp.float32)
                    + b1q).astype(compute_dtype))
    w2q = w2q_ref[:, 0:H].astype(compute_dtype)
    b2q = w2q_ref[:, H:H + 1]
    o_ref[0:D, :] = q + jnp.dot(w2q, h_q, preferred_element_type=jnp.float32) + b2q
    # rows 0..D-1 = q_out, row D = m (carried through), rows D+1..2D = p_out.


# --------------------------------------------------------------------------- #
# Step / trajectory wrappers (no per-step layout churn)
# --------------------------------------------------------------------------- #

def shvv_step(state, t, dt, params, k=1.0, *, max_tile_m=8192,
              hidden_dtype=jnp.float32):
    """One forward() step on the packed lane-dense state [2D+1, M_pad].

    hidden_dtype=jnp.bfloat16 uses the bf16 EUP/MXU path for the correction
    MLP (recommended on v6e/v7x; keep the f32 default on v5e).
    """
    del t  # time-independent synthetic experiment / hypersolver
    rows, m_total = state.shape
    D = (rows - 1) // 2
    assert rows == 2 * D + 1, "state must have 2*D+1 rows (q | m | p)"
    tile_m, n_tiles = _plan(m_total, max_tile_m)
    assert tile_m * n_tiles == m_total, (
        "state width does not match the tile plan; build the state with "
        "pack_state() using the same max_tile_m")

    wparams = _prep_params(params, dt)
    dt32 = jnp.asarray(dt, jnp.float32)
    k32 = jnp.asarray(k, jnp.float32)
    scal = jnp.stack([0.5 * dt32 * k32, dt32])

    state_spec = pl.BlockSpec((rows, tile_m), lambda i: (0, i))
    scal_spec = pl.BlockSpec(memory_space=pltpu.MemorySpace.SMEM)
    weight_specs = [pl.BlockSpec(w.shape, lambda i: (0, 0)) for w in wparams]

    kernel = functools.partial(_shvv_kernel, compute_dtype=hidden_dtype)

    return pl.pallas_call(
        kernel,
        grid=(n_tiles,),
        out_shape=jax.ShapeDtypeStruct((rows, m_total), jnp.float32),
        in_specs=[scal_spec, state_spec] + weight_specs,
        out_specs=state_spec,
        # In-place update of the state buffer (scan carry / integrator state).
        # NOTE: donates the incoming buffer; XLA copies if it cannot donate.
        input_output_aliases={1: 0},
        compiler_params=pltpu.CompilerParams(
            dimension_semantics=("parallel",)),
    )(scal, state, *wparams)


def shvv_trajectory_dense(state0, t_traj, params, k=1.0, *, max_tile_m=8192,
                          hidden_dtype=jnp.float32):
    """BaseSolver.trajectory's inner loop, kept in the packed layout throughout.

    Converts are done once outside (pack_state / unpack_state); returns the
    final packed state.
    """
    ts = jnp.asarray(t_traj, jnp.float32)
    dts = ts[1:] - ts[:-1]

    def body(state, t_dt):
        t_i, dt_i = t_dt
        state = shvv_step(state, t_i, dt_i, params, k=k,
                          max_tile_m=max_tile_m, hidden_dtype=hidden_dtype)
        return state, None

    state_f, _ = jax.lax.scan(body, state0, (ts[:-1], dts))
    return state_f


@functools.partial(jax.jit, static_argnames=("max_tile_m", "hidden_dtype"))
def symplectic_hyper_velocity_verlet(q, p, m, t, dt, params, k=1.0,
                                     max_tile_m=8192, hidden_dtype=jnp.float32):
    """API-parity single step: q, p: [B,N,D]; m: [B,N,1]; t, dt, k scalars."""
    B, N, D = q.shape
    state = pack_state(q, p, m, max_tile_m=max_tile_m)
    state = shvv_step(state, t, dt, params, k=k, max_tile_m=max_tile_m,
                      hidden_dtype=hidden_dtype)
    return unpack_state(state, B, N, D)


# --------------------------------------------------------------------------- #
# Pure-JAX reference + parameter init
# --------------------------------------------------------------------------- #

def _reference(q, p, m, t, dt, params, k=1.0):
    """Pure-JAX reference of the same forward pass (original layout/ordering)."""
    del t
    (w1pq, w1pm, b1p, w2p, b2p, w1qp, w1qm, b1q, w2q, b2q) = params
    B, N, D = q.shape
    qf = q.reshape(-1, D).astype(jnp.float32)
    pf = p.reshape(-1, D).astype(jnp.float32)
    mf = m.reshape(-1, 1).astype(jnp.float32)
    half = 0.5
    pf = pf + half * (-k * qf) * dt
    qf = qf + (pf / mf) * dt
    pf = pf + half * (-k * qf) * dt
    dt3 = dt ** 3
    hp = jnp.tanh(qf @ w1pq + mf @ w1pm + b1p) @ w2p + b2p
    pf = pf + hp * dt3
    hq = jnp.tanh(pf @ w1qp + mf @ w1qm + b1q) @ w2q + b2q
    qf = qf + hq * dt3
    return qf.reshape(B, N, D), pf.reshape(B, N, D)


def _init_params(key, D, H):
    keys = jax.random.split(key, 10)
    def w(k_, shape):
        return (0.1 * jax.random.normal(k_, shape)).astype(jnp.float32)
    # p-correction net: inputs (q, m) -> hidden H -> D
    w1pq = w(keys[0], (D, H)); w1pm = w(keys[1], (1, H)); b1p = w(keys[2], (1, H))
    w2p = w(keys[3], (H, D)); b2p = w(keys[4], (1, D))
    # q-correction net: inputs (p, m) -> hidden H -> D
    w1qp = w(keys[5], (D, H)); w1qm = w(keys[6], (1, H)); b1q = w(keys[7], (1, H))
    w2q = w(keys[8], (H, D)); b2q = w(keys[9], (1, D))
    return (w1pq, w1pm, b1p, w2p, b2p, w1qp, w1qm, b1q, w2q, b2q)


if __name__ == "__main__":
    key = jax.random.PRNGKey(0)
    k_q, k_p, k_m, k_params = jax.random.split(key, 4)

    B, N, D, H = 2, 8, 4, 32            # batch, particles, coord-dim, hidden
    q0 = jax.random.normal(k_q, (B, N, D), dtype=jnp.float32)
    p0 = jax.random.normal(k_p, (B, N, D), dtype=jnp.float32)
    m0 = 0.5 + jax.random.uniform(k_m, (B, N, 1), dtype=jnp.float32)
    params = _init_params(k_params, D, H)
    t, dt, k_spring = 0.0, 0.1, 1.0

    # 1) Small shape: single-tile path, API-parity wrapper.
    q1, p1 = symplectic_hyper_velocity_verlet(q0, p0, m0, t, dt, params, k=k_spring)
    jax.block_until_ready((q1, p1))
    q_ref, p_ref = _reference(q0, p0, m0, t, dt, params, k=k_spring)
    assert jnp.allclose(q1, q_ref, atol=1e-5, rtol=1e-5)
    assert jnp.allclose(p1, p_ref, atol=1e-5, rtol=1e-5)

    # 2) Medium shape: exercises the 2-way split (default) and the tiled +
    #    even-count + padded multi-tile path (small max_tile_m to force it).
    B2, N2 = 4, 635                      # M = 2540 (not a multiple of 128)
    kq2, kp2, km2 = jax.random.split(jax.random.PRNGKey(1), 3)
    q2 = jax.random.normal(kq2, (B2, N2, D), dtype=jnp.float32)
    p2 = jax.random.normal(kp2, (B2, N2, D), dtype=jnp.float32)
    m2 = 0.5 + jax.random.uniform(km2, (B2, N2, 1), dtype=jnp.float32)
    qr2, pr2 = _reference(q2, p2, m2, t, dt, params, k=k_spring)

    q3, p3 = symplectic_hyper_velocity_verlet(q2, p2, m2, t, dt, params, k=k_spring)
    jax.block_until_ready((q3, p3))
    assert jnp.allclose(q3, qr2, atol=1e-5, rtol=1e-5)
    assert jnp.allclose(p3, pr2, atol=1e-5, rtol=1e-5)

    q3b, p3b = symplectic_hyper_velocity_verlet(q2, p2, m2, t, dt, params,
                                                k=k_spring, max_tile_m=512)
    jax.block_until_ready((q3b, p3b))
    assert jnp.allclose(q3b, qr2, atol=1e-5, rtol=1e-5)
    assert jnp.allclose(p3b, pr2, atol=1e-5, rtol=1e-5)

    # 3) 3-step trajectory carrying the packed lane-dense state (one pack/unpack
    #    round trip; no per-step transpose/pad HBM traffic).
    n_steps = 3
    t_traj = jnp.arange(n_steps + 1, dtype=jnp.float32) * dt
    state0 = pack_state(q0, p0, m0)
    traj_fn = jax.jit(lambda s, ts: shvv_trajectory_dense(s, ts, params, k=k_spring))
    state_f = traj_fn(state0, t_traj)
    q4, p4 = unpack_state(state_f, B, N, D)
    jax.block_until_ready((q4, p4))
    dts_host = jax.device_get(t_traj[1:] - t_traj[:-1])
    qr4, pr4 = q0, p0
    for i in range(n_steps):
        qr4, pr4 = _reference(qr4, pr4, m0, 0.0, float(dts_host[i]), params, k=k_spring)
    assert jnp.allclose(q4, qr4, atol=1e-5, rtol=1e-5)
    assert jnp.allclose(p4, pr4, atol=1e-5, rtol=1e-5)

    # 4) bf16 hidden-layer path (EUP bf16 on v6e/v7x; runs everywhere).
    q5, p5 = symplectic_hyper_velocity_verlet(q2, p2, m2, t, dt, params,
                                              k=k_spring, max_tile_m=512,
                                              hidden_dtype=jnp.bfloat16)
    jax.block_until_ready((q5, p5))
    assert jnp.allclose(q5, qr2, atol=1e-3, rtol=1e-3)
    assert jnp.allclose(p5, pr2, atol=1e-3, rtol=1e-3)

    print("KERNEL_OK")
</pallas_src>

<mosaic_0001>
module attributes {stable_mosaic.version = 11 : i64} {
  func.func @_shvv_kernel(%arg0: i32, %arg1: memref<2xf32, #tpu.memory_space<smem>>, %arg2: memref<9x128xf32, #tpu.memory_space<vmem>>, %arg3: memref<32x6xf32, #tpu.memory_space<vmem>>, %arg4: memref<4x33xf32, #tpu.memory_space<vmem>>, %arg5: memref<32x6xf32, #tpu.memory_space<vmem>>, %arg6: memref<4x33xf32, #tpu.memory_space<vmem>>, %arg7: memref<9x128xf32, #tpu.memory_space<vmem>>) attributes {dimension_semantics = [#tpu.dimension_semantics<parallel>], iteration_bounds = array<i64: 1>, scalar_prefetch = 0 : i64, scratch_operands = 0 : i64, tpu.core_type = #tpu.core_type<tc>, window_params = [{transform_indices = @transform_0, window_bounds = array<i64: 2>}, {transform_indices = @transform_1, window_bounds = array<i64: 9, 128>}, {pipeline_mode = #tpu.pipeline_mode<synchronous>, transform_indices = @transform_2, window_bounds = array<i64: 32, 6>}, {pipeline_mode = #tpu.pipeline_mode<synchronous>, transform_indices = @transform_3, window_bounds = array<i64: 4, 33>}, {pipeline_mode = #tpu.pipeline_mode<synchronous>, transform_indices = @transform_4, window_bounds = array<i64: 32, 6>}, {pipeline_mode = #tpu.pipeline_mode<synchronous>, transform_indices = @transform_5, window_bounds = array<i64: 4, 33>}, {transform_indices = @transform_6, window_bounds = array<i64: 9, 128>}]} {
    %c0 = arith.constant 0 : index
    %0 = memref.load %arg1[%c0] : memref<2xf32, #tpu.memory_space<smem>>
    %c1 = arith.constant 1 : index
    %1 = memref.load %arg1[%c1] : memref<2xf32, #tpu.memory_space<smem>>
    %c0_0 = arith.constant 0 : index
    %c0_1 = arith.constant 0 : index
    %2 = vector.load %arg2[%c0_0, %c0_1] : memref<9x128xf32, #tpu.memory_space<vmem>>, vector<4x128xf32>
    %c4 = arith.constant 4 : index
    %c0_2 = arith.constant 0 : index
    %3 = vector.load %arg2[%c4, %c0_2] : memref<9x128xf32, #tpu.memory_space<vmem>>, vector<1x128xf32>
    %c5 = arith.constant 5 : index
    %c0_3 = arith.constant 0 : index
    %4 = vector.load %arg2[%c5, %c0_3] : memref<9x128xf32, #tpu.memory_space<vmem>>, vector<4x128xf32>
    %5 = vector.broadcast %1 : f32 to vector<1x128xf32>
    %6 = arith.divf %5, %3 : vector<1x128xf32>
    %7 = vector.broadcast %0 : f32 to vector<4x128xf32>
    %8 = arith.mulf %7, %2 : vector<4x128xf32>
    %9 = arith.subf %4, %8 : vector<4x128xf32>
    %10 = vector.broadcast %6 : vector<1x128xf32> to vector<4x128xf32>
    %11 = arith.mulf %9, %10 : vector<4x128xf32>
    %12 = arith.addf %2, %11 : vector<4x128xf32>
    %13 = vector.broadcast %0 : f32 to vector<4x128xf32>
    %14 = arith.mulf %13, %12 : vector<4x128xf32>
    %15 = arith.subf %9, %14 : vector<4x128xf32>
    %c0_4 = arith.constant 0 : index
    %c0_5 = arith.constant 0 : index
    %16 = vector.load %arg7[%c0_4, %c0_5] : memref<9x128xf32, #tpu.memory_space<vmem>>, vector<4x128xf32>
    tpu.vector_store %arg7[%c0_4, %c0_5], %12 {strides = array<i32>} : memref<9x128xf32, #tpu.memory_space<vmem>>, vector<4x128xf32>,
    %c4_6 = arith.constant 4 : index
    %c0_7 = arith.constant 0 : index
    %17 = vector.load %arg7[%c4_6, %c0_7] : memref<9x128xf32, #tpu.memory_space<vmem>>, vector<1x128xf32>
    tpu.vector_store %arg7[%c4_6, %c0_7], %3 {strides = array<i32>} : memref<9x128xf32, #tpu.memory_space<vmem>>, vector<1x128xf32>,
    %c0_8 = arith.constant 0 : index
    %c0_9 = arith.constant 0 : index
    %18 = vector.load %arg7[%c0_8, %c0_9] : memref<9x128xf32, #tpu.memory_space<vmem>>, vector<5x128xf32>
    %c0_10 = arith.constant 0 : index
    %c0_11 = arith.constant 0 : index
    %19 = vector.load %arg3[%c0_10, %c0_11] : memref<32x6xf32, #tpu.memory_space<vmem>>, vector<32x5xf32>
    %c0_12 = arith.constant 0 : index
    %c5_13 = arith.constant 5 : index
    %20 = vector.load %arg3[%c0_12, %c5_13] : memref<32x6xf32, #tpu.memory_space<vmem>>, vector<32x1xf32>
    %cst = arith.constant dense<0.000000e+00> : vector<32x128xf32>
    %21 = tpu.matmul %19, %18, %cst {dimension_numbers = #tpu.dot_dimension_numbers<[1], [0], [0], [1], [0, 0, 1, 1], [], []>} : vector<32x5xf32>, vector<5x128xf32>, vector<32x128xf32> -> vector<32x128xf32>
    %22 = vector.broadcast %20 : vector<32x1xf32> to vector<32x128xf32>
    %23 = arith.addf %21, %22 : vector<32x128xf32>
    %24 = math.tanh %23 : vector<32x128xf32>
    %c0_14 = arith.constant 0 : index
    %c0_15 = arith.constant 0 : index
    %25 = vector.load %arg4[%c0_14, %c0_15] : memref<4x33xf32, #tpu.memory_space<vmem>>, vector<4x32xf32>
    %c0_16 = arith.constant 0 : index
    %c32 = arith.constant 32 : index
    %26 = vector.load %arg4[%c0_16, %c32] : memref<4x33xf32, #tpu.memory_space<vmem>>, vector<4x1xf32>
    %cst_17 = arith.constant dense<0.000000e+00> : vector<4x128xf32>
    %27 = tpu.matmul %25, %24, %cst_17 {dimension_numbers = #tpu.dot_dimension_numbers<[1], [0], [0], [1], [0, 0, 1, 1], [], []>} : vector<4x32xf32>, vector<32x128xf32>, vector<4x128xf32> -> vector<4x128xf32>
    %28 = arith.addf %15, %27 : vector<4x128xf32>
    %29 = vector.broadcast %26 : vector<4x1xf32> to vector<4x128xf32>
    %30 = arith.addf %28, %29 : vector<4x128xf32>
    %c5_18 = arith.constant 5 : index
    %c0_19 = arith.constant 0 : index
    %31 = vector.load %arg7[%c5_18, %c0_19] : memref<9x128xf32, #tpu.memory_space<vmem>>, vector<4x128xf32>
    tpu.vector_store %arg7[%c5_18, %c0_19], %30 {strides = array<i32>} : memref<9x128xf32, #tpu.memory_space<vmem>>, vector<4x128xf32>,
    %c4_20 = arith.constant 4 : index
    %c0_21 = arith.constant 0 : index
    %32 = vector.load %arg7[%c4_20, %c0_21] : memref<9x128xf32, #tpu.memory_space<vmem>>, vector<5x128xf32>
    %c0_22 = arith.constant 0 : index
    %c0_23 = arith.constant 0 : index
    %33 = vector.load %arg5[%c0_22, %c0_23] : memref<32x6xf32, #tpu.memory_space<vmem>>, vector<32x5xf32>
    %c0_24 = arith.constant 0 : index
    %c5_25 = arith.constant 5 : index
    %34 = vector.load %arg5[%c0_24, %c5_25] : memref<32x6xf32, #tpu.memory_space<vmem>>, vector<32x1xf32>
    %cst_26 = arith.constant dense<0.000000e+00> : vector<32x128xf32>
    %35 = tpu.matmul %33, %32, %cst_26 {dimension_numbers = #tpu.dot_dimension_numbers<[1], [0], [0], [1], [0, 0, 1, 1], [], []>} : vector<32x5xf32>, vector<5x128xf32>, vector<32x128xf32> -> vector<32x128xf32>
    %36 = vector.broadcast %34 : vector<32x1xf32> to vector<32x128xf32>
    %37 = arith.addf %35, %36 : vector<32x128xf32>
    %38 = math.tanh %37 : vector<32x128xf32>
    %c0_27 = arith.constant 0 : index
    %c0_28 = arith.constant 0 : index
    %39 = vector.load %arg6[%c0_27, %c0_28] : memref<4x33xf32, #tpu.memory_space<vmem>>, vector<4x32xf32>
    %c0_29 = arith.constant 0 : index
    %c32_30 = arith.constant 32 : index
    %40 = vector.load %arg6[%c0_29, %c32_30] : memref<4x33xf32, #tpu.memory_space<vmem>>, vector<4x1xf32>
    %cst_31 = arith.constant dense<0.000000e+00> : vector<4x128xf32>
    %41 = tpu.matmul %39, %38, %cst_31 {dimension_numbers = #tpu.dot_dimension_numbers<[1], [0], [0], [1], [0, 0, 1, 1], [], []>} : vector<4x32xf32>, vector<32x128xf32>, vector<4x128xf32> -> vector<4x128xf32>
    %42 = arith.addf %12, %41 : vector<4x128xf32>
    %43 = vector.broadcast %40 : vector<4x1xf32> to vector<4x128xf32>
    %44 = arith.addf %42, %43 : vector<4x128xf32>
    %c0_32 = arith.constant 0 : index
    %c0_33 = arith.constant 0 : index
    %45 = vector.load %arg7[%c0_32, %c0_33] : memref<9x128xf32, #tpu.memory_space<vmem>>, vector<4x128xf32>
    tpu.vector_store %arg7[%c0_32, %c0_33], %44 {strides = array<i32>} : memref<9x128xf32, #tpu.memory_space<vmem>>, vector<4x128xf32>,
    return
  }
  func.func @transform_0(%arg0: i32) -> i32 {
    %c0_i32 = arith.constant 0 : i32
    %c0_i32_0 = arith.constant 0 : i32
    return %c0_i32 : i32
  }
  func.func @transform_1(%arg0: i32) -> (i32, i32) {
    %c0_i32 = arith.constant 0 : i32
    %c0_i32_0 = arith.constant 0 : i32
    return %c0_i32, %arg0 : i32, i32
  }
  func.func @transform_2(%arg0: i32) -> (i32, i32) {
    %c0_i32 = arith.constant 0 : i32
    %c0_i32_0 = arith.constant 0 : i32
    %c0_i32_1 = arith.constant 0 : i32
    return %c0_i32, %c0_i32_0 : i32, i32
  }
  func.func @transform_3(%arg0: i32) -> (i32, i32) {
    %c0_i32 = arith.constant 0 : i32
    %c0_i32_0 = arith.constant 0 : i32
    %c0_i32_1 = arith.constant 0 : i32
    return %c0_i32, %c0_i32_0 : i32, i32
  }
  func.func @transform_4(%arg0: i32) -> (i32, i32) {
    %c0_i32 = arith.constant 0 : i32
    %c0_i32_0 = arith.constant 0 : i32
    %c0_i32_1 = arith.constant 0 : i32
    return %c0_i32, %c0_i32_0 : i32, i32
  }
  func.func @transform_5(%arg0: i32) -> (i32, i32) {
    %c0_i32 = arith.constant 0 : i32
    %c0_i32_0 = arith.constant 0 : i32
    %c0_i32_1 = arith.constant 0 : i32
    return %c0_i32, %c0_i32_0 : i32, i32
  }
  func.func @transform_6(%arg0: i32) -> (i32, i32) {
    %c0_i32 = arith.constant 0 : i32
    %c0_i32_0 = arith.constant 0 : i32
    return %c0_i32, %arg0 : i32, i32
  }
}

</mosaic_0001>

<bundles_post_ra>
// kernel: symplectic_hyper_velocity_verlet.1
= control target key start
LH: loop header
LB: loop body
LE: loop exit
PB: predicated region body
PF: predicated region fallthrough
CT: control target
= control target key end

     0   :  { %11 = vsyncpa [#allocation3], 0  ;;  %s749_s0 = inlined_call_operand.vmem [shape: f32[2], index: 0, kind: input, shape index: {}]   ;;  %s750_s1 = inlined_call_operand.vmem [shape: f32[9,128], index: 1, kind: input, shape index: {}, may-alias: {1,6}]   ;;  %s751_s2 = inlined_call_operand.vmem [shape: f32[32,6], index: 2, kind: input, shape index: {}]   ;;  %s752_s3 = inlined_call_operand.vmem [shape: f32[4,33], index: 3, kind: input, shape index: {}]   ;;  %s753_s4 = inlined_call_operand.vmem [shape: f32[32,6], index: 4, kind: input, shape index: {}]   ;;  %s754_s5 = inlined_call_operand.vmem [shape: f32[4,33], index: 5, kind: input, shape index: {}]   ;;  %s755_s6 = inlined_call_operand.vmem [shape: f32[9,128], index: 6, kind: output, shape index: {}, may-alias: {1,6}]  }
   0x1   :  { %s18_s23 = sshll.u32 %s749_s0, 4  ;;  %s19_s23 = int_to_ptr.vmem [resolvable:$true] %s18_s23 }
   0x2   :  { %s590_s24 = scalar_lea.vmem %s19_s23, 16  ;;  %p595_p1 = scmp.lt.s32.totalorder %s19_s23, %s19_s23 }
   0x3   :  { %p591_p0 = scmp.ne.s32.totalorder %s19_s23, %s590_s24  ;;  %p596_p2 = scmp.lt.s32.totalorder %s590_s24, %s590_s24 }
   0x5   :  { %p597_p3 = por %p596_p2, %p595_p1 }
   0x7   :  { %p598_p4 = pnand %p597_p3, %p591_p0 }
   0x9   :  { %601 = shalt.err (!%p598_p4)
}
   0xa   :  { %s604_s25 = smov [#allocation2]  }
   0xb   :  { %21 = dma.vmem_to_smem %s19_s23, 16, %s604_s25, [#allocation3]  }
   0xc   :  { %602 = dma.done.wait [#allocation3], 16  }
   0xd   :  { %603 = vsyncadd [#allocation3], 4294967280 }
   0xe   :  { %35 = sfence }
   0xf   :  { %s648_s26 = sld [smem:[#allocation2]]  ;;  %v39_v0 = vld [vmem:[%s750_s1 + $0x4] sm:$0x1]  ;;  %s477_s30 = sld [smem:[#allocation2 + $0x1]]  ;;  %vm82_vm0 = vcmask 39936   ;;  %v47_v2 = vlaneseq  ;;  %v60_v3 = vld [vmem:[%s751_s2 + $0x10] sm:$0xff] }
  0x10   :  { %v58_v1 = vld [vmem:[%s751_s2] sm:$0xff]  ;;  %572 = vrcp.f32 %v39_v0  ;;  %56 = vst [vmem:[%s755_s6 + $0x4] sm:$0x1] %v39_v0  ;;  %v605_v4 = vmov 5   ;;  %v61_v8 = vld [vmem:[%s751_s2 + $0x18] sm:$0xff]  ;;  %v59_v9 = vld [vmem:[%s751_s2 + $0x8] sm:$0xff] }
  0x11   :  { %512 = vmatprep.mubr.msk.f32.mxu0 %vm82_vm0, %v58_v1  ;;  %567 = vset.pattern.permute.xlu1 %v605_v4  ;;  %v48_v7 = vshrl.u32 %v47_v2, 7  ;;  %v267_v11 = vld [vmem:[%s753_s4] sm:$0xff]  ;;  %v686_v18 = vld [vmem:[%s753_s4 + $0x8] sm:$0xff]  ;;  %v693_v21 = vld [vmem:[%s753_s4 + $0x18] sm:$0xff]  ;;  %vm91_vm1 = vcmask 1044480   ;;  %v606_v24 = vmov 0.0|0.0  }
  0x12   :  { %74 = vperm.xlu1 %567, %v60_v3   ;;  %566 = vset.pattern.permute.xlu0 %v605_v4  ;;  %vm607_vm2 = vmmov 0   ;;  %v608_v25 = vmov 0.0   ;;  %v184_v26 = vld [vmem:[%s752_s3] sm:$0xf]  ;;  %v609_v27 = vmov 32   ;;  %vm185_vm3 = vcmask 261120  }
  0x13   :  { %64 = vperm.xlu0 %566, %v58_v1   ;;  %v49_v14 = vsub.s32 0, %v48_v7  ;;  %548 = vmatprep.subr.bf16.mxu1 %v606_v24  ;;  %v269_v46 = vld [vmem:[%s753_s4 + $0x10] sm:$0xff]  ;;  %v391_v55 = vld [vmem:[%s754_s5] sm:$0xf] }
  0x14   :  { %526 = vmatprep.mubr.msk.f32.mxu1 %vm607_vm2, %v608_v25 }
  0x15   :  { %v44_v6 = vstv %s648_s26  ;;  %v41_v13 = vstv %s477_s30 }
  0x16   :  { %79 = vperm.xlu1 %567, %v61_v8  }
  0x17   :  { %v38_v5 = vld [vmem:[%s750_s1] sm:$0xf]  ;;  %69 = vperm.xlu0 %566, %v59_v9   ;;  %v40_v12 = vld [vmem:[%s750_s1 + $0x5] sm:$0xf] }
  0x18   :  { %v45_v10 = vmul.f32 %v44_v6, %v38_v5 }
  0x1a   :  { %v573_v15 = vpop.eup %572  ;;  %273 = vperm.xlu1 %567, %v267_v11   ;;  %v681_v17 = vsub.f32 %v40_v12, %v45_v10 }
  0x1b   :  { %v43_v16 = vmul.f32 %v573_v15, %v41_v13  ;;  %568 = vset.pattern.permute.xlu0 %v609_v27 }
  0x1c   :  { %261 = vperm.xlu0 %568, %v184_v26  }
  0x1d   :  { %v50_v19 = vrot.slane %v43_v16, %v49_v14 }
  0x1e   :  { %278 = vperm.xlu1 %567, %v686_v18  }
  0x1f   :  { %v51_v20 = vmul.f32 %v50_v19, %v681_v17 }
  0x20   :  { %569 = vset.pattern.permute.xlu0 %v605_v4 }
  0x21   :  { %v695_v22 = vadd.f32 %v51_v20, %v38_v5  ;;  %283 = vperm.xlu0 %569, %v269_v46  }
  0x22   :  { %288 = vperm.xlu1 %567, %v693_v21  }
  0x23   :  { %55 = vst [vmem:[%s755_s6] sm:$0xf] %v695_v22  ;;  %v53_v47 = vmul.f32 %v695_v22, %v44_v6 }
  0x25   :  { %571 = vset.pattern.permute.xlu0 %v609_v27  ;;  %v54_v48 = vsub.f32 %v681_v17, %v53_v47 }
  0x26   :  { %570 = vset.pattern.permute.xlu1 %v609_v27 }
  0x27   :  { %467 = vperm.xlu1 %570, %v391_v55  }
  0x2a   :  { %v57_v23 = vld [vmem:[%s755_s6] sm:$0x1f] }
  0x2b   :  { %510 = vmatprep.subr.msk.mxu0 %vm91_vm1, %v57_v23 }
  0x2c   :  { %511 = vmatpush3.msk.msra.mxu0 %vm91_vm1, %v57_v23 }
  0x2d   :  { %513 = vmatmul.mubr.msk.f32.vlgmr.msra.gmra.mrb[0].mxu0 %vm82_vm0, %v59_v9 }
  0x2e   :  { %515 = vmatprep.mubr.msk.f32.mxu0 %vm82_vm0, %v60_v3 }
  0x31   :  { %516 = vmatmul.mubr.msk.f32.gmra.mrb[2].mxu0 %vm82_vm0, %v61_v8 }
  0x32   :  { %531 = vmatprep.mubr.msk.f32.mxu0 %vm82_vm0, %v267_v11 }
  0x91   :  { %v75_v29 = vpop.permute.xlu1 %74 }
  0x92   :  { %v65_v28 = vpop.permute.xlu0 %64 }
  0x95   :  { %v80_v35 = vpop.permute.xlu1 %79 }
  0x96   :  { %v70_v30 = vpop.permute.xlu0 %69 }
  0x99   :  { %v274_v56 = vpop.permute.xlu1 %273 }
  0x9b   :  { %v262_v50 = vpop.permute.xlu0 %261 }
  0x9d   :  { %v279_v57 = vpop.permute.xlu1 %278 }
  0xa0   :  { %v284_v62 = vpop.permute.xlu0 %283 }
  0xa1   :  { %v289_v63 = vpop.permute.xlu1 %288 }
  0xa6   :  { %v468_v11 = vpop.permute.xlu1 %467 }
 0x100   :  { %v514_v31 = vpop.f32.mrb[0].mxu0 }
 0x101   :  { %v167_v32 = vadd.f32 %v514_v31, %v70_v30  ;;  %v161_v33 = vpop.f32.mrb[1].mxu0 }
 0x102   :  { %v162_v34 = vadd.f32 %v161_v33, %v65_v28 }
 0x103   :  { %574 = vtanh.f32 %v167_v32 }
 0x104   :  { %576 = vtanh.f32 %v162_v34  ;;  %v517_v36 = vpop.f32.mrb[2].mxu0 }
 0x105   :  { %v177_v37 = vadd.f32 %v517_v36, %v80_v35  ;;  %v171_v38 = vpop.f32.mrb[3].mxu0 }
 0x106   :  { %v172_v39 = vadd.f32 %v171_v38, %v75_v29 }
 0x107   :  { %578 = vtanh.f32 %v177_v37 }
 0x108   :  { %580 = vtanh.f32 %v172_v39 }
 0x10d   :  { %v575_v40 = vpop.eup %574 }
 0x10e   :  { %v577_v41 = vpop.eup %576 }
 0x10f   :  { %v549_v42 = vpack.c.bf16 %v575_v40, %v577_v41 }
 0x111   :  { %v579_v43 = vpop.eup %578  ;;  %550 = vmatpush3.bf16.msra.mxu1 %v549_v42 }
 0x112   :  { %v581_v44 = vpop.eup %580  ;;  %551 = vmatprep.subr.bf16.mxu1 %v606_v24 }
 0x113   :  { %v552_v45 = vpack.c.bf16 %v579_v43, %v581_v44 }
 0x115   :  { %553 = vmatpush3.bf16.msra.mxu1 %v552_v45 }
 0x116   :  { %554 = vmatprep.subr.bf16.mxu1 %v606_v24 }
 0x118   :  { %527 = vmatmul.mubr.msk.f32.vlgmr.msra.gmra.mrb[0].mxu1 %vm185_vm3, %v184_v26 }
 0x119   :  { %545 = vmatprep.mubr.msk.f32.mxu1 %vm607_vm2, %v608_v25 }
 0x1eb   :  { %v255_v49 = vpop.f32.mrb[0].mxu1 }
 0x1ec   :  { %v259_v51 = vadd.f32 %v255_v49, %v54_v48  ;;  %v528_v52 = vpop.f32.mrb[1].mxu1 }
 0x1ee   :  { %v264_v53 = vadd.f32 %v262_v50, %v259_v51 }
 0x1f0   :  { %265 = vst [vmem:[%s755_s6 + $0x5] sm:$0xf] %v264_v53 }
 0x1f7   :  { %v266_v54 = vld [vmem:[%s755_s6 + $0x4] sm:$0x1f] }
 0x1f8   :  { %529 = vmatprep.subr.msk.mxu0 %vm91_vm1, %v266_v54 }
 0x1f9   :  { %530 = vmatpush3.msk.msra.mxu0 %vm91_vm1, %v266_v54 }
 0x1fa   :  { %532 = vmatmul.mubr.msk.f32.vlgmr.msra.gmra.mrb[4].mxu0 %vm82_vm0, %v686_v18 }
 0x1fb   :  { %534 = vmatprep.mubr.msk.f32.mxu0 %vm82_vm0, %v269_v46 }
 0x1fe   :  { %535 = vmatmul.mubr.msk.f32.gmra.mrb[6].mxu0 %vm82_vm0, %v693_v21 }
 0x2cd   :  { %v533_v58 = vpop.f32.mrb[4].mxu0 }
 0x2ce   :  { %v374_v59 = vadd.f32 %v533_v58, %v279_v57  ;;  %v368_v60 = vpop.f32.mrb[5].mxu0 }
 0x2cf   :  { %v369_v61 = vadd.f32 %v368_v60, %v274_v56 }
 0x2d0   :  { %582 = vtanh.f32 %v374_v59 }
 0x2d1   :  { %584 = vtanh.f32 %v369_v61  ;;  %v536_v0 = vpop.f32.mrb[6].mxu0 }
 0x2d2   :  { %v384_v1 = vadd.f32 %v536_v0, %v289_v63  ;;  %v378_v2 = vpop.f32.mrb[7].mxu0 }
 0x2d3   :  { %v379_v3 = vadd.f32 %v378_v2, %v284_v62 }
 0x2d4   :  { %586 = vtanh.f32 %v384_v1 }
 0x2d5   :  { %588 = vtanh.f32 %v379_v3 }
 0x2da   :  { %v583_v4 = vpop.eup %582 }
 0x2db   :  { %v585_v5 = vpop.eup %584 }
 0x2dc   :  { %v555_v6 = vpack.c.bf16 %v583_v4, %v585_v5 }
 0x2de   :  { %v587_v7 = vpop.eup %586  ;;  %556 = vmatpush3.bf16.msra.mxu1 %v555_v6 }
 0x2df   :  { %v589_v8 = vpop.eup %588  ;;  %557 = vmatprep.subr.bf16.mxu1 %v606_v24 }
 0x2e0   :  { %v558_v9 = vpack.c.bf16 %v587_v7, %v589_v8 }
 0x2e2   :  { %559 = vmatpush3.bf16.msra.mxu1 %v558_v9 }
 0x2e5   :  { %546 = vmatmul.mubr.msk.f32.vlgmr.msra.gmra.mrb[2].mxu1 %vm185_vm3, %v391_v55 }
 0x3b8   :  { %v461_v10 = vpop.f32.mrb[2].mxu1 }
 0x3b9   :  { %v465_v12 = vadd.f32 %v461_v10, %v695_v22  ;;  %v547_v13 = vpop.f32.mrb[3].mxu1 }
 0x3bb   :  { %v470_v14 = vadd.f32 %v468_v11, %v465_v12 }
 0x3bd   :  { %471 = vst [vmem:[%s755_s6] sm:$0xf] %v470_v14 }
 0x3be   :  { %476 = vsyncpa [#allocation3], 1 }

</bundles_post_ra>
